<compile_context>
chip_gen: v6e
topology: v6e:2x2x1
jax: 0.10.0
libtpu: 0.0.40
codegen_flags: <defaults>
</compile_context>

<pallas_src>
import functools

import jax
import jax.numpy as jnp
from jax import lax
from jax.experimental import pallas as pl
from jax.experimental.pallas import tpu as pltpu


def _round_up(x, m):
    return (x + m - 1) // m * m


def _pick_tile(size, cap, align):
    """Pick a tile <= cap (multiple of `align`).  Prefer the largest divisor of
    the align-padded size (=> zero padding); otherwise fall back to cap."""
    padded = _round_up(size, align)
    cap = max(align, min(cap, padded) // align * align)
    best = align
    t = align
    while t <= cap:
        if padded % t == 0:
            best = t
        t += align
    return best if best * 2 >= cap else cap


def _fit_caps_to_budget(tm, tn, tk, comp_isz, out_isz, budget):
    """Shrink tile-size caps (power-of-two halving) until the double-buffered
    working set fits `budget` bytes of VMEM."""
    def ws(tm_, tn_, tk_):
        return (2 * tm_ * tk_ * comp_isz      # x tiles (double buffered)
                + 2 * tn_ * tk_ * comp_isz    # weight tiles
                + 2 * tn_ * 4                 # bias tiles (f32)
                + 2 * tm_ * tn_ * out_isz     # output tiles
                + tm_ * tn_ * 4)              # f32 accumulator scratch
    while ws(tm, tn, tk) > budget:
        if tk > 512:
            tk //= 2
        elif tn > 256:
            tn //= 2
        elif tm > 256:
            tm //= 2
        else:
            break
    return tm, tn, tk


# ----------------------------- kernel bodies --------------------------------

def _matmul_bias_kernel_acc(x_ref, w_ref, b_ref, o_ref, acc_ref, *, precision):
    """One (tm, tn) output tile, accumulated over the k grid axis.

    x_ref [tm, tk], w_ref [tn, tk] (PyTorch layout, NOT transposed),
    b_ref [1, tn], o_ref [tm, tn], acc_ref [tm, tn] f32 (resident across k).
    """
    k = pl.program_id(2)

    @pl.when(k == 0)
    def _():
        # Fold the bias into the accumulator init: added exactly once, free.
        acc_ref[...] = jnp.broadcast_to(
            b_ref[...].astype(jnp.float32), acc_ref.shape)

    # Contract x[tm, tk] with w[tn, tk] over the shared d_model axis; the MXU
    # handles the transposed-RHS contraction natively (no weight transpose).
    acc_ref[...] += lax.dot_general(
        x_ref[...], w_ref[...],
        dimension_numbers=(((1,), (1,)), ((), ())),
        preferred_element_type=jnp.float32,
        precision=precision)

    @pl.when(k == pl.num_programs(2) - 1)
    def _():
        o_ref[...] = acc_ref[...].astype(o_ref.dtype)


def _matmul_bias_kernel_single(x_ref, w_ref, b_ref, o_ref, *, precision):
    """Single-k variant (tk == padded d_model): no scratch accumulator."""
    acc = lax.dot_general(
        x_ref[...], w_ref[...],
        dimension_numbers=(((1,), (1,)), ((), ())),
        preferred_element_type=jnp.float32,
        precision=precision)
    o_ref[...] = (acc + b_ref[...].astype(jnp.float32)).astype(o_ref.dtype)


# ------------------------------ pallas_call ----------------------------------

@functools.partial(
    jax.jit,
    static_argnames=("tm", "tn", "tk", "vocab", "out_dtype", "compute_dtype",
                     "precision", "vmem_limit_bytes"))
def _generator_call(x2d, w_p, b_p, *, tm, tn, tk, vocab, out_dtype,
                    compute_dtype, precision, vmem_limit_bytes):
    m, d_model = x2d.shape
    n_p, k_p = w_p.shape

    m_p = _round_up(m, tm)
    x_p = x2d.astype(compute_dtype)
    if (m_p, k_p) != (m, d_model):
        x_p = jnp.pad(x_p, ((0, m_p - m), (0, k_p - d_model)))

    grid_m, grid_n, grid_k = m_p // tm, n_p // tn, k_p // tk

    comp_isz = jnp.dtype(compute_dtype).itemsize
    out_isz = jnp.dtype(out_dtype).itemsize
    # HBM traffic including re-reads: x is streamed grid_n times, W grid_m times.
    cost = pl.CostEstimate(
        flops=2 * m_p * n_p * k_p,
        transcendentals=0,
        bytes_accessed=(grid_n * x_p.size * comp_isz
                        + grid_m * w_p.size * comp_isz
                        + grid_m * b_p.size * 4
                        + m_p * n_p * out_isz))

    if grid_k == 1:
        out_p = pl.pallas_call(
            functools.partial(_matmul_bias_kernel_single, precision=precision),
            out_shape=jax.ShapeDtypeStruct((m_p, n_p), out_dtype),
            grid_spec=pltpu.PrefetchScalarGridSpec(
                num_scalar_prefetch=0,
                grid=(grid_m, grid_n),
                in_specs=[
                    pl.BlockSpec((tm, tk), lambda i, j: (i, 0)),   # x
                    pl.BlockSpec((tn, tk), lambda i, j: (j, 0)),   # W
                    pl.BlockSpec((1, tn), lambda i, j: (0, j)),    # b
                ],
                out_specs=pl.BlockSpec((tm, tn), lambda i, j: (i, j)),
            ),
            compiler_params=pltpu.CompilerParams(
                dimension_semantics=("parallel", "parallel"),
                vmem_limit_bytes=vmem_limit_bytes),
            cost_estimate=cost,
        )(x_p, w_p, b_p)
    else:
        out_p = pl.pallas_call(
            functools.partial(_matmul_bias_kernel_acc, precision=precision),
            out_shape=jax.ShapeDtypeStruct((m_p, n_p), out_dtype),
            grid_spec=pltpu.PrefetchScalarGridSpec(
                num_scalar_prefetch=0,
                grid=(grid_m, grid_n, grid_k),
                in_specs=[
                    pl.BlockSpec((tm, tk), lambda i, j, k: (i, k)),   # x
                    pl.BlockSpec((tn, tk), lambda i, j, k: (j, k)),   # W
                    pl.BlockSpec((1, tn), lambda i, j, k: (0, j)),    # b
                ],
                out_specs=pl.BlockSpec((tm, tn), lambda i, j, k: (i, j)),
                scratch_shapes=[pltpu.VMEM((tm, tn), jnp.float32)],
            ),
            compiler_params=pltpu.CompilerParams(
                dimension_semantics=("parallel", "parallel", "arbitrary"),
                vmem_limit_bytes=vmem_limit_bytes),
            cost_estimate=cost,
        )(x_p, w_p, b_p)

    if (m_p, n_p) != (m, vocab):
        out_p = out_p[:m, :vocab]
    return out_p


# ------------------------------ user-facing API -------------------------------

class PallasGenerator:
    """Pallas TPU version of `Generator(d_model, vocab_size)`: y = x @ W.T + b.

    Weight cast + padding are done once at construction (hoisted out of the
    hot path); per-call work is just the activation pad + one pallas_call.
    """

    def __init__(self, weight, bias, *, tm=1024, tn=1024, tk=2048,
                 compute_dtype=jnp.bfloat16, out_dtype=None, precision=None,
                 vmem_budget_bytes=40 << 20):
        vocab, d_model = weight.shape
        assert bias.shape == (vocab,)
        self.vocab = int(vocab)
        self.d_model = int(d_model)
        self.compute_dtype = jnp.dtype(compute_dtype)
        self.out_dtype = None if out_dtype is None else jnp.dtype(out_dtype)
        self.precision = precision

        comp_isz = self.compute_dtype.itemsize
        # Budget for the smallest-VMEM target (v7x: 64 MiB physical per TC);
        # assume worst-case 4-byte output for the budget check.
        tm_cap, tn_cap, tk_cap = _fit_caps_to_budget(
            _round_up(tm, 8), _round_up(tn, 128), _round_up(tk, 128),
            comp_isz, 4, vmem_budget_bytes)
        self.tm_cap = tm_cap
        # tn / tk prefer divisors of the padded vocab / d_model (zero weight
        # padding, fully contiguous weight-tile DMAs when tk == d_model).
        self.tn = _pick_tile(self.vocab, tn_cap, 128)
        self.tk = _pick_tile(self.d_model, tk_cap, 128)
        # M only needs sublane alignment: 8 for f32, 16 for bf16, 32 for 8-bit.
        self.m_align = max(8, 32 // comp_isz)

        n_p = _round_up(self.vocab, self.tn)
        k_p = _round_up(self.d_model, self.tk)

        # ---- one-time weight prep (hoisted out of the forward path) ----
        w = jnp.asarray(weight).astype(self.compute_dtype)
        if (n_p, k_p) != (self.vocab, self.d_model):
            w = jnp.pad(w, ((0, n_p - self.vocab), (0, k_p - self.d_model)))
        b = jnp.asarray(bias).astype(jnp.float32)
        if n_p != self.vocab:
            b = jnp.pad(b, (0, n_p - self.vocab))
        self.w_p = w
        self.b_p = b.reshape(1, n_p)

    def __call__(self, x):
        *lead, d_model = x.shape
        assert d_model == self.d_model
        m = 1
        for s in lead:
            m *= int(s)
        x2d = x.reshape(m, d_model)

        out_dtype = self.out_dtype if self.out_dtype is not None else jnp.dtype(x.dtype)
        tm = min(self.tm_cap, _round_up(m, self.m_align))

        comp_isz = self.compute_dtype.itemsize
        out_isz = jnp.dtype(out_dtype).itemsize
        ws = (2 * tm * self.tk * comp_isz + 2 * self.tn * self.tk * comp_isz
              + 2 * self.tn * 4 + 2 * tm * self.tn * out_isz
              + tm * self.tn * 4)
        vmem_limit = int(min(max(ws + (8 << 20), 32 << 20), 50 << 20))

        out = _generator_call(
            x2d, self.w_p, self.b_p,
            tm=tm, tn=self.tn, tk=self.tk, vocab=self.vocab,
            out_dtype=jnp.dtype(out_dtype), compute_dtype=self.compute_dtype,
            precision=self.precision, vmem_limit_bytes=vmem_limit)
        return out.reshape(*lead, self.vocab)


def generator_forward(x, weight, bias, **kwargs):
    """Functional convenience wrapper. For repeated calls prefer constructing
    PallasGenerator once (weight cast/pad is then done a single time)."""
    return PallasGenerator(weight, bias, **kwargs)(x)


# ----------------------------------- test ------------------------------------

if __name__ == "__main__":
    key = jax.random.PRNGKey(0)

    # --- Small test (shapes implied by the module's forward) -----------------
    batch, seq, d_model, vocab_size = 2, 8, 32, 64
    kx, kw, kb, key = jax.random.split(key, 4)
    x = jax.random.normal(kx, (batch, seq, d_model), dtype=jnp.float32)
    bound = 1.0 / (d_model ** 0.5)
    weight = jax.random.uniform(kw, (vocab_size, d_model), minval=-bound,
                                maxval=bound, dtype=jnp.float32)
    bias = jax.random.uniform(kb, (vocab_size,), minval=-bound, maxval=bound,
                              dtype=jnp.float32)
    ref = x @ weight.T + bias

    # Default fast path: bf16 operands, f32 accumulation.
    gen = PallasGenerator(weight, bias)
    out = jax.block_until_ready(gen(x))
    assert out.shape == (batch, seq, vocab_size)
    assert out.dtype == x.dtype
    assert jnp.allclose(out, ref, atol=5e-2, rtol=5e-2)

    # f32-operand path (exercises the non-cast code path).
    gen_f32 = PallasGenerator(weight, bias, compute_dtype=jnp.float32)
    out_f32 = jax.block_until_ready(gen_f32(x))
    assert jnp.allclose(out_f32, ref, atol=1e-2, rtol=1e-2)

    # --- Multi-tile test: exercises (M, vocab, d_model) grid + accumulator ---
    batch2, seq2, d_model2, vocab2 = 2, 192, 1024, 1280
    kx2, kw2, kb2, key = jax.random.split(key, 4)
    x2 = jax.random.normal(kx2, (batch2, seq2, d_model2), dtype=jnp.float32)
    bound2 = 1.0 / (d_model2 ** 0.5)
    weight2 = jax.random.uniform(kw2, (vocab2, d_model2), minval=-bound2,
                                 maxval=bound2, dtype=jnp.float32)
    bias2 = jax.random.uniform(kb2, (vocab2,), minval=-bound2, maxval=bound2,
                               dtype=jnp.float32)

    # Force a multi-step reduction (tk=512 -> k grid = 2) and multi-tile vocab
    # (tn picks 640 -> n grid = 2) to exercise the accumulator kernel.
    gen2 = PallasGenerator(weight2, bias2, tk=512)
    out2 = jax.block_until_ready(gen2(x2))
    assert out2.shape == (batch2, seq2, vocab2)

    # Reference matching the kernel's numerics (bf16 operands, f32 accumulate).
    ref2_bf16 = (jnp.dot(x2.astype(jnp.bfloat16),
                         weight2.astype(jnp.bfloat16).T,
                         preferred_element_type=jnp.float32)
                 + bias2).astype(x2.dtype)
    assert jnp.allclose(out2, ref2_bf16, atol=1e-2, rtol=1e-2)
    # Loose check against full-f32 PyTorch semantics.
    ref2 = x2 @ weight2.T + bias2
    assert jnp.allclose(out2, ref2, atol=3e-2, rtol=3e-2)

    print("KERNEL_OK")
</pallas_src>

<mosaic_0001>
module attributes {stable_mosaic.version = 11 : i64} {
  func.func @_matmul_bias_kernel_single(%arg0: i32, %arg1: i32, %arg2: memref<16x128xbf16, #tpu.memory_space<vmem>>, %arg3: memref<128x128xbf16, #tpu.memory_space<vmem>>, %arg4: memref<1x128xf32, #tpu.memory_space<vmem>>, %arg5: memref<16x128xf32, #tpu.memory_space<vmem>>) attributes {dimension_semantics = [#tpu.dimension_semantics<parallel>, #tpu.dimension_semantics<parallel>], iteration_bounds = array<i64: 1, 1>, scalar_prefetch = 0 : i64, scratch_operands = 0 : i64, tpu.core_type = #tpu.core_type<tc>, window_params = [{transform_indices = @transform_0, window_bounds = array<i64: 16, 128>}, {transform_indices = @transform_1, window_bounds = array<i64: 128, 128>}, {transform_indices = @transform_2, window_bounds = array<i64: 1, 128>}, {transform_indices = @transform_3, window_bounds = array<i64: 16, 128>}]} {
    %c0 = arith.constant 0 : index
    %c0_0 = arith.constant 0 : index
    %0 = vector.load %arg2[%c0, %c0_0] : memref<16x128xbf16, #tpu.memory_space<vmem>>, vector<16x128xbf16>
    %c0_1 = arith.constant 0 : index
    %c0_2 = arith.constant 0 : index
    %1 = vector.load %arg3[%c0_1, %c0_2] : memref<128x128xbf16, #tpu.memory_space<vmem>>, vector<128x128xbf16>
    %cst = arith.constant dense<0.000000e+00> : vector<16x128xf32>
    %2 = tpu.matmul %0, %1, %cst {dimension_numbers = #tpu.dot_dimension_numbers<[1], [1], [0], [0], [0, 0, 1, 0], [], []>} : vector<16x128xbf16>, vector<128x128xbf16>, vector<16x128xf32> -> vector<16x128xf32>
    %c0_3 = arith.constant 0 : index
    %c0_4 = arith.constant 0 : index
    %3 = vector.load %arg4[%c0_3, %c0_4] : memref<1x128xf32, #tpu.memory_space<vmem>>, vector<1x128xf32>
    %4 = vector.broadcast %3 : vector<1x128xf32> to vector<16x128xf32>
    %5 = arith.addf %2, %4 : vector<16x128xf32>
    %c0_5 = arith.constant 0 : index
    %c0_6 = arith.constant 0 : index
    %6 = vector.load %arg5[%c0_5, %c0_6] : memref<16x128xf32, #tpu.memory_space<vmem>>, vector<16x128xf32>
    tpu.vector_store %arg5[%c0_5, %c0_6], %5 {strides = array<i32>} : memref<16x128xf32, #tpu.memory_space<vmem>>, vector<16x128xf32>,
    return
  }
  func.func @transform_0(%arg0: i32, %arg1: i32) -> (i32, i32) {
    %c0_i32 = arith.constant 0 : i32
    %c0_i32_0 = arith.constant 0 : i32
    return %arg0, %c0_i32 : i32, i32
  }
  func.func @transform_1(%arg0: i32, %arg1: i32) -> (i32, i32) {
    %c0_i32 = arith.constant 0 : i32
    %c0_i32_0 = arith.constant 0 : i32
    return %arg1, %c0_i32 : i32, i32
  }
  func.func @transform_2(%arg0: i32, %arg1: i32) -> (i32, i32) {
    %c0_i32 = arith.constant 0 : i32
    %c0_i32_0 = arith.constant 0 : i32
    return %c0_i32, %arg1 : i32, i32
  }
  func.func @transform_3(%arg0: i32, %arg1: i32) -> (i32, i32) {
    %c0_i32 = arith.constant 0 : i32
    return %arg0, %arg1 : i32, i32
  }
}

</mosaic_0001>

<bundles_post_ra>
// kernel: _generator_call.1
= control target key start
LH: loop header
LB: loop body
LE: loop exit
PB: predicated region body
PF: predicated region fallthrough
CT: control target
= control target key end

     0   :  { %8 = vsyncpa [#allocation3], 0  ;;  %s309_s0 = inlined_call_operand.vmem [shape: bf16[16,128], index: 0, kind: input, shape index: {}]   ;;  %s310_s1 = inlined_call_operand.hbm [shape: bf16[128,128], index: 1, kind: input, shape index: {}]   ;;  %s311_s2 = inlined_call_operand.vmem [shape: f32[1,128], index: 2, kind: input, shape index: {}]   ;;  %s312_s3 = inlined_call_operand.hbm [shape: f32[16,128], index: 3, kind: output, shape index: {}]  }
   0x1   :  { %9 = vsyncpa [#allocation4], 0  ;;  %s269_s12 = smov [#allocation2]  }
   0x2   :  { %s17_s13 = sshll.u32 %s269_s12, 4  ;;  %s18_s13 = int_to_ptr.vmem [resolvable:$true] %s17_s13 }
   0x3   :  { %s233_s14 = scalar_lea.vmem %s18_s13, 1024  ;;  %p238_p1 = scmp.lt.s32.totalorder %s18_s13, %s18_s13 }
   0x4   :  { %p234_p0 = scmp.ne.s32.totalorder %s18_s13, %s233_s14  ;;  %p239_p2 = scmp.lt.s32.totalorder %s233_s14, %s233_s14 }
   0x6   :  { %p240_p3 = por %p239_p2, %p238_p1 }
   0x8   :  { %p241_p4 = pnand %p240_p3, %p234_p0 }
   0xa   :  { %244 = shalt.err (!%p241_p4)
}
   0xb   :  { %s270_s15 = smov 64   ;;  %s271_s16 = smov 4  }
   0xc   :  { %23 = dma.hbm_to_vmem [thread:$0]  %s310_s1, 1024, %s18_s13, [#allocation3], %s270_s15, %s270_s15, %s271_s16  }
   0xd   :  { %265 = dma.done.wait [#allocation3], 1024  }
   0xe   :  { %266 = vsyncadd [#allocation3], 4294966272  ;;  %v272_v0 = vmov 0.0   ;;  %vm273_vm0 = vmmov 0   ;;  %v216_v1 = vld [vmem:[#allocation2 + $0x38] sm:$0xff]   ;;  %v217_v2 = vld [vmem:[#allocation2 + $0x30] sm:$0xff]  }
   0xf   :  { %188 = vmatprep.subr.bf16.mxu0 %v272_v0  ;;  %204 = vmatprep.mubr.msk.bf16.mxu0 %vm273_vm0, %v272_v0  ;;  %v218_v3 = vld [vmem:[#allocation2 + $0x28] sm:$0xff]   ;;  %v219_v4 = vld [vmem:[#allocation2 + $0x20] sm:$0xff]   ;;  %v220_v5 = vld [vmem:[#allocation2 + $0x18] sm:$0xff]   ;;  %s274_s22 = smov [#allocation5]  }
  0x10   :  { %189 = vmatpush3.bf16.xpose.msra.mxu0 %v216_v1  ;;  %v221_v6 = vld [vmem:[#allocation2 + $0x10] sm:$0xff]   ;;  %v222_v7 = vld [vmem:[#allocation2 + $0x8] sm:$0xff]   ;;  %v223_v8 = vld [vmem:[#allocation2] sm:$0xff]   ;;  %s157_s23 = sshll.u32 %s274_s22, 4  ;;  %s158_s23 = int_to_ptr.vmem [resolvable:$true] %s157_s23 }
  0x11   :  { %190 = vmatprep.subr.bf16.mxu0 %v272_v0  ;;  %v224_v9 = vld [vmem:[%s309_s0] sm:$0xff]   ;;  %s245_s24 = scalar_lea.vmem %s158_s23, 256  ;;  %p250_p6 = scmp.lt.s32.totalorder %s158_s23, %s158_s23 }
  0x12   :  { %v169_v10 = vld [vmem:[%s311_s2] ss:$0 sm:$0xff]  ;;  %p246_p5 = scmp.ne.s32.totalorder %s158_s23, %s245_s24  ;;  %p251_p7 = scmp.lt.s32.totalorder %s245_s24, %s245_s24 }
  0x14   :  { %p252_p8 = por %p251_p7, %p250_p6 }
  0x16   :  { %p253_p9 = pnand %p252_p8, %p246_p5 }
  0x18   :  { %191 = vmatpush3.bf16.xpose.msra.mxu0 %v217_v2 }
  0x19   :  { %192 = vmatprep.subr.bf16.mxu0 %v272_v0 }
  0x20   :  { %193 = vmatpush3.bf16.xpose.msra.mxu0 %v218_v3 }
  0x21   :  { %194 = vmatprep.subr.bf16.mxu0 %v272_v0 }
  0x28   :  { %195 = vmatpush3.bf16.xpose.msra.mxu0 %v219_v4 }
  0x29   :  { %196 = vmatprep.subr.bf16.mxu0 %v272_v0 }
  0x30   :  { %197 = vmatpush3.bf16.xpose.msra.mxu0 %v220_v5 }
  0x31   :  { %198 = vmatprep.subr.bf16.mxu0 %v272_v0 }
  0x38   :  { %199 = vmatpush3.bf16.xpose.msra.mxu0 %v221_v6 }
  0x39   :  { %200 = vmatprep.subr.bf16.mxu0 %v272_v0 }
  0x40   :  { %201 = vmatpush3.bf16.xpose.msra.mxu0 %v222_v7 }
  0x41   :  { %202 = vmatprep.subr.bf16.mxu0 %v272_v0 }
  0x48   :  { %203 = vmatpush3.bf16.xpose.msra.mxu0 %v223_v8 }
  0x4f   :  { %205 = vmatmul.mubr.bf16.vlgmr.msra.gmra.mxu0 %v224_v9 }
 0x10f   :  { %v143_v11 = vpop.f32.mrf.mxu0 }
 0x110   :  { %v144_v12 = vadd.f32 %v169_v10, %v143_v11 }
 0x111   :  { %v206_v13 = vpop.f32.mrf.mxu0 }
 0x112   :  { %150 = vst [vmem:[#allocation5] sm:$0xff] %v144_v12 }
 0x113   :  { %v146_v14 = vpop.f32.mrf.mxu0 }
 0x114   :  { %v147_v15 = vadd.f32 %v169_v10, %v146_v14 }
 0x115   :  { %v207_v16 = vpop.f32.mrf.mxu0 }
 0x116   :  { %151 = vst [vmem:[#allocation5 + $0x8] sm:$0xff] %v147_v15 }
 0x117   :  { %256 = shalt.err (!%p253_p9)
}
 0x118   :  { %s275_s0 = smov 128   ;;  %s276_s2 = smov 8  }
 0x119   :  { %163 = dma.vmem_to_hbm [thread:$0]  %s158_s23, 256, %s312_s3, [#allocation4], %s275_s0, %s275_s0, %s276_s2  }
 0x11a   :  { %267 = dma.done.wait [#allocation4], 256  }
 0x11b   :  { %268 = vsyncadd [#allocation4], 4294967040 }
 0x11c   :  { %167 = vsyncpa [#allocation3], 1 }
 0x11d   :  { %168 = vsyncpa [#allocation4], 1 }

</bundles_post_ra>
